<compile_context>
chip_gen: v5e
topology: v5e:2x2
jax: 0.10.0
libtpu: 0.0.40
codegen_flags: <defaults>
</compile_context>

<pallas_src>
import functools

import jax
import jax.numpy as jnp
from jax.experimental import pallas as pl
from jax.experimental.pallas import tpu as pltpu


def _dsconv_kernel(x_ref, dw_ref, b1_ref, pw_ref, b2_ref, o_ref,
                   *, N, Cin, Cout, H, W):
    """Fused depthwise-3x3 + BN + ReLU6 + pointwise-1x1 + BN, whole batch.

    x_ref : (N*Cin, H*W)   VMEM  input, batch*channels on sublanes, H*W on lanes
    dw_ref: (N*Cin, 9)     VMEM  depthwise weights (BN1 scale folded, tiled per image)
    b1_ref: (N*Cin, 1)     VMEM  BN1 folded bias (tiled per image)
    pw_ref: (Cout, Cin)    SMEM  pointwise weights (BN2 scale folded) as scalars
    b2_ref: (Cout,)        SMEM  BN2 folded bias as scalars
    o_ref : (N*Cout, H*W)  VMEM  output
    """
    HW = H * W

    x = x_ref[...]            # (N*Cin, HW) f32
    dw = dw_ref[...]          # (N*Cin, 9)  loaded once, sliced per tap
    b1 = b1_ref[...]          # (N*Cin, 1)

    # Flat spatial coordinates (hoisted once; W is a power of 2 -> shift/AND).
    lane = jax.lax.broadcasted_iota(jnp.int32, (1, HW), 1)
    if (W & (W - 1)) == 0:
        yy = lane >> (W.bit_length() - 1)
        xx = lane & (W - 1)
    else:
        yy = lane // W
        xx = lane - yy * W

    # Boundary masks hoisted out of the tap loop (valid-neighbor predicates).
    row_lo = yy >= 1          # dy == -1
    row_hi = yy <= H - 2      # dy == +1
    col_lo = xx >= 1          # dx == -1
    col_hi = xx <= W - 2      # dx == +1

    # 3x3 depthwise conv with "same" zero padding: 9 lane-rolled,
    # boundary-masked VPU FMAs.  Lane rolls wrap within a row, i.e. within
    # the same image, and wrapped lanes are masked out (select semantics).
    acc = jnp.zeros_like(x)
    for ky in range(3):
        for kx in range(3):
            dy, dx = ky - 1, kx - 1
            k = ky * 3 + kx
            w_col = dw[:, k:k + 1]                       # (N*Cin, 1)
            if dy == 0 and dx == 0:
                acc = acc + x * w_col
                continue
            shift = (-(dy * W + dx)) % HW
            shifted = pltpu.roll(x, shift=shift, axis=1)  # XLU slot
            conds = []
            if dy == -1:
                conds.append(row_lo)
            if dy == 1:
                conds.append(row_hi)
            if dx == -1:
                conds.append(col_lo)
            if dx == 1:
                conds.append(col_hi)
            m = conds[0]
            for c in conds[1:]:
                m = m & c
            acc = acc + jnp.where(m, shifted, 0.0) * w_col

    # BN1 (scale folded into dw) + ReLU6.
    y = jnp.clip(acc + b1, 0.0, 6.0)                     # (N*Cin, HW)

    # Pointwise 1x1 conv + BN2 bias on the VPU: broadcast-scalar FMAs.
    # (A 4x4x256 matmul would waste the MXU; if C grows >= ~64 switch back to
    #  jnp.dot on (Cout, Cin) x (Cin, N*HW).)
    pw_s = [[pw_ref[co, ci] for ci in range(Cin)] for co in range(Cout)]
    b2_s = [b2_ref[co] for co in range(Cout)]

    rows = []
    for n in range(N):
        y_n = y[n * Cin:(n + 1) * Cin]                   # (Cin, HW) static slice
        for co in range(Cout):
            r = y_n[0:1] * pw_s[co][0]
            for ci in range(1, Cin):
                r = r + y_n[ci:ci + 1] * pw_s[co][ci]
            rows.append(r + b2_s[co])
    z = jnp.concatenate(rows, axis=0)                    # (N*Cout, HW)

    # Single full-tile, lane-dense store.
    o_ref[...] = z.astype(o_ref.dtype)


def fold_bn(gamma, beta, running_mean, running_var, eps=1e-5):
    scale = gamma / jnp.sqrt(running_var + eps)
    bias = beta - running_mean * scale
    return scale, bias


def dsconv_forward(x_nchw, params):
    """PyTorch-equivalent DSConv forward. x_nchw: (N, Cin, H, W) float32."""
    N, Cin, H, W = x_nchw.shape
    Cout = params["w_pw"].shape[0]
    HW = H * W

    s1, b1 = fold_bn(params["bn1_gamma"], params["bn1_beta"],
                     params["bn1_mean"], params["bn1_var"])
    s2, b2 = fold_bn(params["bn2_gamma"], params["bn2_beta"],
                     params["bn2_mean"], params["bn2_var"])

    # Fold BN scales into the bias-free linear conv weights (wrapper-side,
    # tiny); tile per-channel quantities across the batch so they line up with
    # the (N*Cin, HW) sublane packing.
    dw = (params["w_dw"] * s1[:, None, None]).reshape(Cin, 9)
    dw_t = jnp.tile(dw, (N, 1)).astype(jnp.float32)            # (N*Cin, 9)
    b1_t = jnp.tile(b1.reshape(Cin, 1), (N, 1)).astype(jnp.float32)  # (N*Cin, 1)
    pw = (params["w_pw"] * s2[:, None]).astype(jnp.float32)    # (Cout, Cin)
    b2c = b2.astype(jnp.float32)                               # (Cout,)

    # (N, Cin, H, W) -> (N*Cin, H*W): batch*channels on sublanes, spatial on
    # lanes -> full (8, 128) vreg occupancy, no transpose.
    x = x_nchw.reshape(N * Cin, HW).astype(jnp.float32)

    kernel = functools.partial(_dsconv_kernel, N=N, Cin=Cin, Cout=Cout, H=H, W=W)

    out = pl.pallas_call(
        kernel,
        out_shape=jax.ShapeDtypeStruct((N * Cout, HW), jnp.float32),
        # No grid: whole batch in one step (kB-scale blocks, overhead-bound).
        in_specs=[
            pl.BlockSpec(memory_space=pltpu.MemorySpace.VMEM),  # x
            pl.BlockSpec(memory_space=pltpu.MemorySpace.VMEM),  # dw (tiled)
            pl.BlockSpec(memory_space=pltpu.MemorySpace.VMEM),  # b1 (tiled)
            pl.BlockSpec(memory_space=pltpu.MemorySpace.SMEM),  # pw scalars
            pl.BlockSpec(memory_space=pltpu.MemorySpace.SMEM),  # b2 scalars
        ],
        out_specs=pl.BlockSpec(memory_space=pltpu.MemorySpace.VMEM),
    )(x, dw_t, b1_t, pw, b2c)

    return out.reshape(N, Cout, H, W)


def _reference_forward(x_nchw, params):
    """Plain-JAX reference (lax.conv), for a sanity check."""
    Cin = x_nchw.shape[1]
    s1, b1 = fold_bn(params["bn1_gamma"], params["bn1_beta"],
                     params["bn1_mean"], params["bn1_var"])
    s2, b2 = fold_bn(params["bn2_gamma"], params["bn2_beta"],
                     params["bn2_mean"], params["bn2_var"])

    # Depthwise 3x3 (groups = Cin).
    w_dw = params["w_dw"][:, None, :, :]  # (Cin, 1, 3, 3) OIHW
    y = jax.lax.conv_general_dilated(
        x_nchw, w_dw, window_strides=(1, 1), padding=((1, 1), (1, 1)),
        dimension_numbers=("NCHW", "OIHW", "NCHW"), feature_group_count=Cin)
    y = y * s1[None, :, None, None] + b1[None, :, None, None]
    y = jnp.clip(y, 0.0, 6.0)

    # Pointwise 1x1.
    w_pw = params["w_pw"][:, :, None, None]  # (Cout, Cin, 1, 1) OIHW
    z = jax.lax.conv_general_dilated(
        y, w_pw, window_strides=(1, 1), padding=((0, 0), (0, 0)),
        dimension_numbers=("NCHW", "OIHW", "NCHW"))
    return z * s2[None, :, None, None] + b2[None, :, None, None]


if __name__ == "__main__":
    # Small shapes consistent with the module: DSConv(4, 4).
    # Input NCHW = (2, 4, 16, 16).
    N, Cin, H, W = 2, 4, 16, 16
    Cout = 4

    key = jax.random.PRNGKey(0)
    k = jax.random.split(key, 10)

    x = jax.random.normal(k[0], (N, Cin, H, W), jnp.float32)

    params = {
        # depthwise weights (Cin, 3, 3); pointwise weights (Cout, Cin)
        "w_dw": 0.2 * jax.random.normal(k[1], (Cin, 3, 3), jnp.float32),
        "w_pw": 0.2 * jax.random.normal(k[2], (Cout, Cin), jnp.float32),
        # BatchNorm (inference mode): synthetic running stats
        "bn1_gamma": 1.0 + 0.1 * jax.random.normal(k[3], (Cin,), jnp.float32),
        "bn1_beta": 0.05 * jax.random.normal(k[4], (Cin,), jnp.float32),
        "bn1_mean": 0.1 * jax.random.normal(k[5], (Cin,), jnp.float32),
        "bn1_var": 1.0 + 0.1 * jax.random.uniform(k[6], (Cin,), jnp.float32),
        "bn2_gamma": 1.0 + 0.1 * jax.random.normal(k[7], (Cout,), jnp.float32),
        "bn2_beta": 0.05 * jax.random.normal(k[8], (Cout,), jnp.float32),
        "bn2_mean": 0.1 * jax.random.normal(k[9], (Cout,), jnp.float32),
        "bn2_var": 1.0 + 0.1 * jax.random.uniform(k[0], (Cout,), jnp.float32),
    }

    out = jax.jit(dsconv_forward)(x, params)
    out = jax.block_until_ready(out)
    assert out.shape == (N, Cout, H, W), out.shape

    ref = _reference_forward(x, params)
    assert jnp.allclose(out, ref, rtol=1e-4, atol=1e-4), (
        float(jnp.max(jnp.abs(out - ref))))

    print("KERNEL_OK")
</pallas_src>

<mosaic_0001>
module attributes {stable_mosaic.version = 11 : i64} {
  func.func @_dsconv_kernel(%arg0: memref<8x256xf32, #tpu.memory_space<vmem>>, %arg1: memref<8x9xf32, #tpu.memory_space<vmem>>, %arg2: memref<8x1xf32, #tpu.memory_space<vmem>>, %arg3: memref<4x4xf32, #tpu.memory_space<smem>>, %arg4: memref<4xf32, #tpu.memory_space<smem>>, %arg5: memref<8x256xf32, #tpu.memory_space<vmem>>) attributes {dimension_semantics = [], scalar_prefetch = 0 : i64, scratch_operands = 0 : i64, tpu.core_type = #tpu.core_type<tc>} {
    %c0 = arith.constant 0 : index
    %c0_0 = arith.constant 0 : index
    %0 = vector.load %arg0[%c0, %c0_0] : memref<8x256xf32, #tpu.memory_space<vmem>>, vector<8x256xf32>
    %c0_1 = arith.constant 0 : index
    %c0_2 = arith.constant 0 : index
    %1 = vector.load %arg1[%c0_1, %c0_2] : memref<8x9xf32, #tpu.memory_space<vmem>>, vector<8x9xf32>
    %c0_3 = arith.constant 0 : index
    %c0_4 = arith.constant 0 : index
    %2 = vector.load %arg2[%c0_3, %c0_4] : memref<8x1xf32, #tpu.memory_space<vmem>>, vector<8x1xf32>
    %3 = tpu.iota {dimensions = array<i32: 1>} : vector<1x256xi32>
    %c4_i32 = arith.constant 4 : i32
    %4 = vector.broadcast %c4_i32 : i32 to vector<1x256xi32>
    %5 = arith.shrsi %3, %4 : vector<1x256xi32>
    %c15_i32 = arith.constant 15 : i32
    %6 = vector.broadcast %c15_i32 : i32 to vector<1x256xi32>
    %7 = arith.andi %3, %6 : vector<1x256xi32>
    %c1_i32 = arith.constant 1 : i32
    %8 = vector.broadcast %c1_i32 : i32 to vector<1x256xi32>
    %9 = arith.cmpi sge, %5, %8 : vector<1x256xi32>
    %c14_i32 = arith.constant 14 : i32
    %10 = vector.broadcast %c14_i32 : i32 to vector<1x256xi32>
    %11 = arith.cmpi sle, %5, %10 : vector<1x256xi32>
    %c1_i32_5 = arith.constant 1 : i32
    %12 = vector.broadcast %c1_i32_5 : i32 to vector<1x256xi32>
    %13 = arith.cmpi sge, %7, %12 : vector<1x256xi32>
    %c14_i32_6 = arith.constant 14 : i32
    %14 = vector.broadcast %c14_i32_6 : i32 to vector<1x256xi32>
    %15 = arith.cmpi sle, %7, %14 : vector<1x256xi32>
    %cst = arith.constant 0.000000e+00 : f32
    %16 = vector.broadcast %cst : f32 to vector<8x256xf32>
    %17 = vector.extract_strided_slice %1 {offsets = [0, 0], sizes = [8, 1], strides = [1, 1]} : vector<8x9xf32> to vector<8x1xf32>
    %c17_i32 = arith.constant 17 : i32
    %18 = tpu.dynamic_rotate %0 by %c17_i32 dim 1 : vector<8x256xf32>, i32 -> vector<8x256xf32>
    %19 = arith.andi %9, %13 : vector<1x256xi1>
    %cst_7 = arith.constant 0.000000e+00 : f32
    %20 = vector.shape_cast %19 : vector<1x256xi1> to vector<1x256xi1>
    %21 = vector.broadcast %20 : vector<1x256xi1> to vector<8x256xi1>
    %22 = vector.broadcast %cst_7 : f32 to vector<8x256xf32>
    %23 = arith.select %21, %18, %22 : vector<8x256xi1>, vector<8x256xf32>
    %24 = vector.broadcast %17 : vector<8x1xf32> to vector<8x256xf32>
    %25 = arith.mulf %23, %24 : vector<8x256xf32>
    %26 = arith.addf %16, %25 : vector<8x256xf32>
    %27 = vector.extract_strided_slice %1 {offsets = [0, 1], sizes = [8, 1], strides = [1, 1]} : vector<8x9xf32> to vector<8x1xf32>
    %c16_i32 = arith.constant 16 : i32
    %28 = tpu.dynamic_rotate %0 by %c16_i32 dim 1 : vector<8x256xf32>, i32 -> vector<8x256xf32>
    %cst_8 = arith.constant 0.000000e+00 : f32
    %29 = vector.shape_cast %9 : vector<1x256xi1> to vector<1x256xi1>
    %30 = vector.broadcast %29 : vector<1x256xi1> to vector<8x256xi1>
    %31 = vector.broadcast %cst_8 : f32 to vector<8x256xf32>
    %32 = arith.select %30, %28, %31 : vector<8x256xi1>, vector<8x256xf32>
    %33 = vector.broadcast %27 : vector<8x1xf32> to vector<8x256xf32>
    %34 = arith.mulf %32, %33 : vector<8x256xf32>
    %35 = arith.addf %26, %34 : vector<8x256xf32>
    %36 = vector.extract_strided_slice %1 {offsets = [0, 2], sizes = [8, 1], strides = [1, 1]} : vector<8x9xf32> to vector<8x1xf32>
    %c15_i32_9 = arith.constant 15 : i32
    %37 = tpu.dynamic_rotate %0 by %c15_i32_9 dim 1 : vector<8x256xf32>, i32 -> vector<8x256xf32>
    %38 = arith.andi %9, %15 : vector<1x256xi1>
    %cst_10 = arith.constant 0.000000e+00 : f32
    %39 = vector.shape_cast %38 : vector<1x256xi1> to vector<1x256xi1>
    %40 = vector.broadcast %39 : vector<1x256xi1> to vector<8x256xi1>
    %41 = vector.broadcast %cst_10 : f32 to vector<8x256xf32>
    %42 = arith.select %40, %37, %41 : vector<8x256xi1>, vector<8x256xf32>
    %43 = vector.broadcast %36 : vector<8x1xf32> to vector<8x256xf32>
    %44 = arith.mulf %42, %43 : vector<8x256xf32>
    %45 = arith.addf %35, %44 : vector<8x256xf32>
    %46 = vector.extract_strided_slice %1 {offsets = [0, 3], sizes = [8, 1], strides = [1, 1]} : vector<8x9xf32> to vector<8x1xf32>
    %c1_i32_11 = arith.constant 1 : i32
    %47 = tpu.dynamic_rotate %0 by %c1_i32_11 dim 1 : vector<8x256xf32>, i32 -> vector<8x256xf32>
    %cst_12 = arith.constant 0.000000e+00 : f32
    %48 = vector.shape_cast %13 : vector<1x256xi1> to vector<1x256xi1>
    %49 = vector.broadcast %48 : vector<1x256xi1> to vector<8x256xi1>
    %50 = vector.broadcast %cst_12 : f32 to vector<8x256xf32>
    %51 = arith.select %49, %47, %50 : vector<8x256xi1>, vector<8x256xf32>
    %52 = vector.broadcast %46 : vector<8x1xf32> to vector<8x256xf32>
    %53 = arith.mulf %51, %52 : vector<8x256xf32>
    %54 = arith.addf %45, %53 : vector<8x256xf32>
    %55 = vector.extract_strided_slice %1 {offsets = [0, 4], sizes = [8, 1], strides = [1, 1]} : vector<8x9xf32> to vector<8x1xf32>
    %56 = vector.broadcast %55 : vector<8x1xf32> to vector<8x256xf32>
    %57 = arith.mulf %0, %56 : vector<8x256xf32>
    %58 = arith.addf %54, %57 : vector<8x256xf32>
    %59 = vector.extract_strided_slice %1 {offsets = [0, 5], sizes = [8, 1], strides = [1, 1]} : vector<8x9xf32> to vector<8x1xf32>
    %c255_i32 = arith.constant 255 : i32
    %60 = tpu.dynamic_rotate %0 by %c255_i32 dim 1 : vector<8x256xf32>, i32 -> vector<8x256xf32>
    %cst_13 = arith.constant 0.000000e+00 : f32
    %61 = vector.shape_cast %15 : vector<1x256xi1> to vector<1x256xi1>
    %62 = vector.broadcast %61 : vector<1x256xi1> to vector<8x256xi1>
    %63 = vector.broadcast %cst_13 : f32 to vector<8x256xf32>
    %64 = arith.select %62, %60, %63 : vector<8x256xi1>, vector<8x256xf32>
    %65 = vector.broadcast %59 : vector<8x1xf32> to vector<8x256xf32>
    %66 = arith.mulf %64, %65 : vector<8x256xf32>
    %67 = arith.addf %58, %66 : vector<8x256xf32>
    %68 = vector.extract_strided_slice %1 {offsets = [0, 6], sizes = [8, 1], strides = [1, 1]} : vector<8x9xf32> to vector<8x1xf32>
    %c241_i32 = arith.constant 241 : i32
    %69 = tpu.dynamic_rotate %0 by %c241_i32 dim 1 : vector<8x256xf32>, i32 -> vector<8x256xf32>
    %70 = arith.andi %11, %13 : vector<1x256xi1>
    %cst_14 = arith.constant 0.000000e+00 : f32
    %71 = vector.shape_cast %70 : vector<1x256xi1> to vector<1x256xi1>
    %72 = vector.broadcast %71 : vector<1x256xi1> to vector<8x256xi1>
    %73 = vector.broadcast %cst_14 : f32 to vector<8x256xf32>
    %74 = arith.select %72, %69, %73 : vector<8x256xi1>, vector<8x256xf32>
    %75 = vector.broadcast %68 : vector<8x1xf32> to vector<8x256xf32>
    %76 = arith.mulf %74, %75 : vector<8x256xf32>
    %77 = arith.addf %67, %76 : vector<8x256xf32>
    %78 = vector.extract_strided_slice %1 {offsets = [0, 7], sizes = [8, 1], strides = [1, 1]} : vector<8x9xf32> to vector<8x1xf32>
    %c240_i32 = arith.constant 240 : i32
    %79 = tpu.dynamic_rotate %0 by %c240_i32 dim 1 : vector<8x256xf32>, i32 -> vector<8x256xf32>
    %cst_15 = arith.constant 0.000000e+00 : f32
    %80 = vector.shape_cast %11 : vector<1x256xi1> to vector<1x256xi1>
    %81 = vector.broadcast %80 : vector<1x256xi1> to vector<8x256xi1>
    %82 = vector.broadcast %cst_15 : f32 to vector<8x256xf32>
    %83 = arith.select %81, %79, %82 : vector<8x256xi1>, vector<8x256xf32>
    %84 = vector.broadcast %78 : vector<8x1xf32> to vector<8x256xf32>
    %85 = arith.mulf %83, %84 : vector<8x256xf32>
    %86 = arith.addf %77, %85 : vector<8x256xf32>
    %87 = vector.extract_strided_slice %1 {offsets = [0, 8], sizes = [8, 1], strides = [1, 1]} : vector<8x9xf32> to vector<8x1xf32>
    %c239_i32 = arith.constant 239 : i32
    %88 = tpu.dynamic_rotate %0 by %c239_i32 dim 1 : vector<8x256xf32>, i32 -> vector<8x256xf32>
    %89 = arith.andi %11, %15 : vector<1x256xi1>
    %cst_16 = arith.constant 0.000000e+00 : f32
    %90 = vector.shape_cast %89 : vector<1x256xi1> to vector<1x256xi1>
    %91 = vector.broadcast %90 : vector<1x256xi1> to vector<8x256xi1>
    %92 = vector.broadcast %cst_16 : f32 to vector<8x256xf32>
    %93 = arith.select %91, %88, %92 : vector<8x256xi1>, vector<8x256xf32>
    %94 = vector.broadcast %87 : vector<8x1xf32> to vector<8x256xf32>
    %95 = arith.mulf %93, %94 : vector<8x256xf32>
    %96 = arith.addf %86, %95 : vector<8x256xf32>
    %97 = vector.broadcast %2 : vector<8x1xf32> to vector<8x256xf32>
    %98 = arith.addf %96, %97 : vector<8x256xf32>
    %cst_17 = arith.constant 0.000000e+00 : f32
    %cst_18 = arith.constant 6.000000e+00 : f32
    %99 = vector.broadcast %cst_17 : f32 to vector<8x256xf32>
    %100 = arith.maximumf %99, %98 : vector<8x256xf32>
    %101 = vector.broadcast %cst_18 : f32 to vector<8x256xf32>
    %102 = arith.minimumf %101, %100 : vector<8x256xf32>
    %c0_19 = arith.constant 0 : index
    %c0_20 = arith.constant 0 : index
    %103 = memref.load %arg3[%c0_19, %c0_20] : memref<4x4xf32, #tpu.memory_space<smem>>
    %c0_21 = arith.constant 0 : index
    %c1 = arith.constant 1 : index
    %104 = memref.load %arg3[%c0_21, %c1] : memref<4x4xf32, #tpu.memory_space<smem>>
    %c0_22 = arith.constant 0 : index
    %c2 = arith.constant 2 : index
    %105 = memref.load %arg3[%c0_22, %c2] : memref<4x4xf32, #tpu.memory_space<smem>>
    %c0_23 = arith.constant 0 : index
    %c3 = arith.constant 3 : index
    %106 = memref.load %arg3[%c0_23, %c3] : memref<4x4xf32, #tpu.memory_space<smem>>
    %c1_24 = arith.constant 1 : index
    %c0_25 = arith.constant 0 : index
    %107 = memref.load %arg3[%c1_24, %c0_25] : memref<4x4xf32, #tpu.memory_space<smem>>
    %c1_26 = arith.constant 1 : index
    %c1_27 = arith.constant 1 : index
    %108 = memref.load %arg3[%c1_26, %c1_27] : memref<4x4xf32, #tpu.memory_space<smem>>
    %c1_28 = arith.constant 1 : index
    %c2_29 = arith.constant 2 : index
    %109 = memref.load %arg3[%c1_28, %c2_29] : memref<4x4xf32, #tpu.memory_space<smem>>
    %c1_30 = arith.constant 1 : index
    %c3_31 = arith.constant 3 : index
    %110 = memref.load %arg3[%c1_30, %c3_31] : memref<4x4xf32, #tpu.memory_space<smem>>
    %c2_32 = arith.constant 2 : index
    %c0_33 = arith.constant 0 : index
    %111 = memref.load %arg3[%c2_32, %c0_33] : memref<4x4xf32, #tpu.memory_space<smem>>
    %c2_34 = arith.constant 2 : index
    %c1_35 = arith.constant 1 : index
    %112 = memref.load %arg3[%c2_34, %c1_35] : memref<4x4xf32, #tpu.memory_space<smem>>
    %c2_36 = arith.constant 2 : index
    %c2_37 = arith.constant 2 : index
    %113 = memref.load %arg3[%c2_36, %c2_37] : memref<4x4xf32, #tpu.memory_space<smem>>
    %c2_38 = arith.constant 2 : index
    %c3_39 = arith.constant 3 : index
    %114 = memref.load %arg3[%c2_38, %c3_39] : memref<4x4xf32, #tpu.memory_space<smem>>
    %c3_40 = arith.constant 3 : index
    %c0_41 = arith.constant 0 : index
    %115 = memref.load %arg3[%c3_40, %c0_41] : memref<4x4xf32, #tpu.memory_space<smem>>
    %c3_42 = arith.constant 3 : index
    %c1_43 = arith.constant 1 : index
    %116 = memref.load %arg3[%c3_42, %c1_43] : memref<4x4xf32, #tpu.memory_space<smem>>
    %c3_44 = arith.constant 3 : index
    %c2_45 = arith.constant 2 : index
    %117 = memref.load %arg3[%c3_44, %c2_45] : memref<4x4xf32, #tpu.memory_space<smem>>
    %c3_46 = arith.constant 3 : index
    %c3_47 = arith.constant 3 : index
    %118 = memref.load %arg3[%c3_46, %c3_47] : memref<4x4xf32, #tpu.memory_space<smem>>
    %c0_48 = arith.constant 0 : index
    %119 = memref.load %arg4[%c0_48] : memref<4xf32, #tpu.memory_space<smem>>
    %c1_49 = arith.constant 1 : index
    %120 = memref.load %arg4[%c1_49] : memref<4xf32, #tpu.memory_space<smem>>
    %c2_50 = arith.constant 2 : index
    %121 = memref.load %arg4[%c2_50] : memref<4xf32, #tpu.memory_space<smem>>
    %c3_51 = arith.constant 3 : index
    %122 = memref.load %arg4[%c3_51] : memref<4xf32, #tpu.memory_space<smem>>
    %123 = vector.extract_strided_slice %102 {offsets = [0, 0], sizes = [4, 256], strides = [1, 1]} : vector<8x256xf32> to vector<4x256xf32>
    %124 = vector.extract_strided_slice %123 {offsets = [0, 0], sizes = [1, 256], strides = [1, 1]} : vector<4x256xf32> to vector<1x256xf32>
    %125 = vector.broadcast %103 : f32 to vector<1x256xf32>
    %126 = arith.mulf %124, %125 : vector<1x256xf32>
    %127 = vector.extract_strided_slice %123 {offsets = [1, 0], sizes = [1, 256], strides = [1, 1]} : vector<4x256xf32> to vector<1x256xf32>
    %128 = vector.broadcast %104 : f32 to vector<1x256xf32>
    %129 = arith.mulf %127, %128 : vector<1x256xf32>
    %130 = arith.addf %126, %129 : vector<1x256xf32>
    %131 = vector.extract_strided_slice %123 {offsets = [2, 0], sizes = [1, 256], strides = [1, 1]} : vector<4x256xf32> to vector<1x256xf32>
    %132 = vector.broadcast %105 : f32 to vector<1x256xf32>
    %133 = arith.mulf %131, %132 : vector<1x256xf32>
    %134 = arith.addf %130, %133 : vector<1x256xf32>
    %135 = vector.extract_strided_slice %123 {offsets = [3, 0], sizes = [1, 256], strides = [1, 1]} : vector<4x256xf32> to vector<1x256xf32>
    %136 = vector.broadcast %106 : f32 to vector<1x256xf32>
    %137 = arith.mulf %135, %136 : vector<1x256xf32>
    %138 = arith.addf %134, %137 : vector<1x256xf32>
    %139 = vector.broadcast %119 : f32 to vector<1x256xf32>
    %140 = arith.addf %138, %139 : vector<1x256xf32>
    %141 = vector.extract_strided_slice %123 {offsets = [0, 0], sizes = [1, 256], strides = [1, 1]} : vector<4x256xf32> to vector<1x256xf32>
    %142 = vector.broadcast %107 : f32 to vector<1x256xf32>
    %143 = arith.mulf %141, %142 : vector<1x256xf32>
    %144 = vector.extract_strided_slice %123 {offsets = [1, 0], sizes = [1, 256], strides = [1, 1]} : vector<4x256xf32> to vector<1x256xf32>
    %145 = vector.broadcast %108 : f32 to vector<1x256xf32>
    %146 = arith.mulf %144, %145 : vector<1x256xf32>
    %147 = arith.addf %143, %146 : vector<1x256xf32>
    %148 = vector.extract_strided_slice %123 {offsets = [2, 0], sizes = [1, 256], strides = [1, 1]} : vector<4x256xf32> to vector<1x256xf32>
    %149 = vector.broadcast %109 : f32 to vector<1x256xf32>
    %150 = arith.mulf %148, %149 : vector<1x256xf32>
    %151 = arith.addf %147, %150 : vector<1x256xf32>
    %152 = vector.extract_strided_slice %123 {offsets = [3, 0], sizes = [1, 256], strides = [1, 1]} : vector<4x256xf32> to vector<1x256xf32>
    %153 = vector.broadcast %110 : f32 to vector<1x256xf32>
    %154 = arith.mulf %152, %153 : vector<1x256xf32>
    %155 = arith.addf %151, %154 : vector<1x256xf32>
    %156 = vector.broadcast %120 : f32 to vector<1x256xf32>
    %157 = arith.addf %155, %156 : vector<1x256xf32>
    %158 = vector.extract_strided_slice %123 {offsets = [0, 0], sizes = [1, 256], strides = [1, 1]} : vector<4x256xf32> to vector<1x256xf32>
    %159 = vector.broadcast %111 : f32 to vector<1x256xf32>
    %160 = arith.mulf %158, %159 : vector<1x256xf32>
    %161 = vector.extract_strided_slice %123 {offsets = [1, 0], sizes = [1, 256], strides = [1, 1]} : vector<4x256xf32> to vector<1x256xf32>
    %162 = vector.broadcast %112 : f32 to vector<1x256xf32>
    %163 = arith.mulf %161, %162 : vector<1x256xf32>
    %164 = arith.addf %160, %163 : vector<1x256xf32>
    %165 = vector.extract_strided_slice %123 {offsets = [2, 0], sizes = [1, 256], strides = [1, 1]} : vector<4x256xf32> to vector<1x256xf32>
    %166 = vector.broadcast %113 : f32 to vector<1x256xf32>
    %167 = arith.mulf %165, %166 : vector<1x256xf32>
    %168 = arith.addf %164, %167 : vector<1x256xf32>
    %169 = vector.extract_strided_slice %123 {offsets = [3, 0], sizes = [1, 256], strides = [1, 1]} : vector<4x256xf32> to vector<1x256xf32>
    %170 = vector.broadcast %114 : f32 to vector<1x256xf32>
    %171 = arith.mulf %169, %170 : vector<1x256xf32>
    %172 = arith.addf %168, %171 : vector<1x256xf32>
    %173 = vector.broadcast %121 : f32 to vector<1x256xf32>
    %174 = arith.addf %172, %173 : vector<1x256xf32>
    %175 = vector.extract_strided_slice %123 {offsets = [0, 0], sizes = [1, 256], strides = [1, 1]} : vector<4x256xf32> to vector<1x256xf32>
    %176 = vector.broadcast %115 : f32 to vector<1x256xf32>
    %177 = arith.mulf %175, %176 : vector<1x256xf32>
    %178 = vector.extract_strided_slice %123 {offsets = [1, 0], sizes = [1, 256], strides = [1, 1]} : vector<4x256xf32> to vector<1x256xf32>
    %179 = vector.broadcast %116 : f32 to vector<1x256xf32>
    %180 = arith.mulf %178, %179 : vector<1x256xf32>
    %181 = arith.addf %177, %180 : vector<1x256xf32>
    %182 = vector.extract_strided_slice %123 {offsets = [2, 0], sizes = [1, 256], strides = [1, 1]} : vector<4x256xf32> to vector<1x256xf32>
    %183 = vector.broadcast %117 : f32 to vector<1x256xf32>
    %184 = arith.mulf %182, %183 : vector<1x256xf32>
    %185 = arith.addf %181, %184 : vector<1x256xf32>
    %186 = vector.extract_strided_slice %123 {offsets = [3, 0], sizes = [1, 256], strides = [1, 1]} : vector<4x256xf32> to vector<1x256xf32>
    %187 = vector.broadcast %118 : f32 to vector<1x256xf32>
    %188 = arith.mulf %186, %187 : vector<1x256xf32>
    %189 = arith.addf %185, %188 : vector<1x256xf32>
    %190 = vector.broadcast %122 : f32 to vector<1x256xf32>
    %191 = arith.addf %189, %190 : vector<1x256xf32>
    %192 = vector.extract_strided_slice %102 {offsets = [4, 0], sizes = [4, 256], strides = [1, 1]} : vector<8x256xf32> to vector<4x256xf32>
    %193 = vector.extract_strided_slice %192 {offsets = [0, 0], sizes = [1, 256], strides = [1, 1]} : vector<4x256xf32> to vector<1x256xf32>
    %194 = vector.broadcast %103 : f32 to vector<1x256xf32>
    %195 = arith.mulf %193, %194 : vector<1x256xf32>
    %196 = vector.extract_strided_slice %192 {offsets = [1, 0], sizes = [1, 256], strides = [1, 1]} : vector<4x256xf32> to vector<1x256xf32>
    %197 = vector.broadcast %104 : f32 to vector<1x256xf32>
    %198 = arith.mulf %196, %197 : vector<1x256xf32>
    %199 = arith.addf %195, %198 : vector<1x256xf32>
    %200 = vector.extract_strided_slice %192 {offsets = [2, 0], sizes = [1, 256], strides = [1, 1]} : vector<4x256xf32> to vector<1x256xf32>
    %201 = vector.broadcast %105 : f32 to vector<1x256xf32>
    %202 = arith.mulf %200, %201 : vector<1x256xf32>
    %203 = arith.addf %199, %202 : vector<1x256xf32>
    %204 = vector.extract_strided_slice %192 {offsets = [3, 0], sizes = [1, 256], strides = [1, 1]} : vector<4x256xf32> to vector<1x256xf32>
    %205 = vector.broadcast %106 : f32 to vector<1x256xf32>
    %206 = arith.mulf %204, %205 : vector<1x256xf32>
    %207 = arith.addf %203, %206 : vector<1x256xf32>
    %208 = vector.broadcast %119 : f32 to vector<1x256xf32>
    %209 = arith.addf %207, %208 : vector<1x256xf32>
    %210 = vector.extract_strided_slice %192 {offsets = [0, 0], sizes = [1, 256], strides = [1, 1]} : vector<4x256xf32> to vector<1x256xf32>
    %211 = vector.broadcast %107 : f32 to vector<1x256xf32>
    %212 = arith.mulf %210, %211 : vector<1x256xf32>
    %213 = vector.extract_strided_slice %192 {offsets = [1, 0], sizes = [1, 256], strides = [1, 1]} : vector<4x256xf32> to vector<1x256xf32>
    %214 = vector.broadcast %108 : f32 to vector<1x256xf32>
    %215 = arith.mulf %213, %214 : vector<1x256xf32>
    %216 = arith.addf %212, %215 : vector<1x256xf32>
    %217 = vector.extract_strided_slice %192 {offsets = [2, 0], sizes = [1, 256], strides = [1, 1]} : vector<4x256xf32> to vector<1x256xf32>
    %218 = vector.broadcast %109 : f32 to vector<1x256xf32>
    %219 = arith.mulf %217, %218 : vector<1x256xf32>
    %220 = arith.addf %216, %219 : vector<1x256xf32>
    %221 = vector.extract_strided_slice %192 {offsets = [3, 0], sizes = [1, 256], strides = [1, 1]} : vector<4x256xf32> to vector<1x256xf32>
    %222 = vector.broadcast %110 : f32 to vector<1x256xf32>
    %223 = arith.mulf %221, %222 : vector<1x256xf32>
    %224 = arith.addf %220, %223 : vector<1x256xf32>
    %225 = vector.broadcast %120 : f32 to vector<1x256xf32>
    %226 = arith.addf %224, %225 : vector<1x256xf32>
    %227 = vector.extract_strided_slice %192 {offsets = [0, 0], sizes = [1, 256], strides = [1, 1]} : vector<4x256xf32> to vector<1x256xf32>
    %228 = vector.broadcast %111 : f32 to vector<1x256xf32>
    %229 = arith.mulf %227, %228 : vector<1x256xf32>
    %230 = vector.extract_strided_slice %192 {offsets = [1, 0], sizes = [1, 256], strides = [1, 1]} : vector<4x256xf32> to vector<1x256xf32>
    %231 = vector.broadcast %112 : f32 to vector<1x256xf32>
    %232 = arith.mulf %230, %231 : vector<1x256xf32>
    %233 = arith.addf %229, %232 : vector<1x256xf32>
    %234 = vector.extract_strided_slice %192 {offsets = [2, 0], sizes = [1, 256], strides = [1, 1]} : vector<4x256xf32> to vector<1x256xf32>
    %235 = vector.broadcast %113 : f32 to vector<1x256xf32>
    %236 = arith.mulf %234, %235 : vector<1x256xf32>
    %237 = arith.addf %233, %236 : vector<1x256xf32>
    %238 = vector.extract_strided_slice %192 {offsets = [3, 0], sizes = [1, 256], strides = [1, 1]} : vector<4x256xf32> to vector<1x256xf32>
    %239 = vector.broadcast %114 : f32 to vector<1x256xf32>
    %240 = arith.mulf %238, %239 : vector<1x256xf32>
    %241 = arith.addf %237, %240 : vector<1x256xf32>
    %242 = vector.broadcast %121 : f32 to vector<1x256xf32>
    %243 = arith.addf %241, %242 : vector<1x256xf32>
    %244 = vector.extract_strided_slice %192 {offsets = [0, 0], sizes = [1, 256], strides = [1, 1]} : vector<4x256xf32> to vector<1x256xf32>
    %245 = vector.broadcast %115 : f32 to vector<1x256xf32>
    %246 = arith.mulf %244, %245 : vector<1x256xf32>
    %247 = vector.extract_strided_slice %192 {offsets = [1, 0], sizes = [1, 256], strides = [1, 1]} : vector<4x256xf32> to vector<1x256xf32>
    %248 = vector.broadcast %116 : f32 to vector<1x256xf32>
    %249 = arith.mulf %247, %248 : vector<1x256xf32>
    %250 = arith.addf %246, %249 : vector<1x256xf32>
    %251 = vector.extract_strided_slice %192 {offsets = [2, 0], sizes = [1, 256], strides = [1, 1]} : vector<4x256xf32> to vector<1x256xf32>
    %252 = vector.broadcast %117 : f32 to vector<1x256xf32>
    %253 = arith.mulf %251, %252 : vector<1x256xf32>
    %254 = arith.addf %250, %253 : vector<1x256xf32>
    %255 = vector.extract_strided_slice %192 {offsets = [3, 0], sizes = [1, 256], strides = [1, 1]} : vector<4x256xf32> to vector<1x256xf32>
    %256 = vector.broadcast %118 : f32 to vector<1x256xf32>
    %257 = arith.mulf %255, %256 : vector<1x256xf32>
    %258 = arith.addf %254, %257 : vector<1x256xf32>
    %259 = vector.broadcast %122 : f32 to vector<1x256xf32>
    %260 = arith.addf %258, %259 : vector<1x256xf32>
    %261 = tpu.concatenate %140, %157, %174, %191, %209, %226, %243, %260 in 0 : vector<1x256xf32>, vector<1x256xf32>, vector<1x256xf32>, vector<1x256xf32>, vector<1x256xf32>, vector<1x256xf32>, vector<1x256xf32>, vector<1x256xf32> -> vector<8x256xf32>
    %c0_52 = arith.constant 0 : index
    %c0_53 = arith.constant 0 : index
    %262 = vector.load %arg5[%c0_52, %c0_53] : memref<8x256xf32, #tpu.memory_space<vmem>>, vector<8x256xf32>
    tpu.vector_store %arg5[%c0_52, %c0_53], %261 {strides = array<i32>} : memref<8x256xf32, #tpu.memory_space<vmem>>, vector<8x256xf32>,
    return
  }
}

</mosaic_0001>

<bundles_post_ra>
// kernel: dsconv_forward.1
= control target key start
LH: loop header
LB: loop body
LE: loop exit
PB: predicated region body
PF: predicated region fallthrough
CT: control target
= control target key end

     0   :  { %10 = vsyncpa [#allocation3], 0  ;;  %s909_s0 = inlined_call_operand.vmem [shape: f32[8,256], index: 0, kind: input, shape index: {}]   ;;  %s910_s1 = inlined_call_operand.vmem [shape: f32[8,9], index: 1, kind: input, shape index: {}]   ;;  %s911_s2 = inlined_call_operand.vmem [shape: f32[8,1], index: 2, kind: input, shape index: {}]   ;;  %s912_s3 = inlined_call_operand.vmem [shape: f32[4,4], index: 3, kind: input, shape index: {}]   ;;  %s913_s4 = inlined_call_operand.vmem [shape: f32[4], index: 4, kind: input, shape index: {}]   ;;  %s914_s5 = inlined_call_operand.vmem [shape: f32[8,256], index: 5, kind: output, shape index: {}]  }
   0x1   :  { %s23_s20 = sshll.u32 %s912_s3, 4  ;;  %s24_s20 = int_to_ptr.vmem [resolvable:$true] %s23_s20 }
   0x2   :  { %11 = vsyncpa [#allocation5], 0  ;;  %s32_s23 = sshll.u32 %s913_s4, 4  ;;  %s559_s24 = smov [#allocation2]   ;;  %s33_s23 = int_to_ptr.vmem [resolvable:$true] %s32_s23 }
   0x3   :  { %26 = dma.vmem_to_smem %s24_s20, 64, %s559_s24, [#allocation3]  }
   0x4   :  { %s560_s25 = smov [#allocation4]  }
   0x5   :  { %35 = dma.vmem_to_smem %s33_s23, 16, %s560_s25, [#allocation5]  }
   0x6   :  { %555 = dma.done.wait [#allocation3], 64  }
   0x7   :  { %556 = vsyncadd [#allocation3], 4294967232 }
   0x8   :  { %557 = dma.done.wait [#allocation5], 16  }
   0x9   :  { %558 = vsyncadd [#allocation5], 4294967280 }
   0xa   :  { %44 = sfence }
   0xb   :  { %v617_v0 = vld [vmem:[%s909_s0] sm:$0xff]  ;;  %v561_v2 = vmov 0   ;;  %s562_s4 = smov 17   ;;  %v626_v3 = vld [vmem:[%s909_s0 + $0x8] sm:$0xff]  ;;  %s563_s6 = smov 16   ;;  %v564_v4 = vmov 1   ;;  %v49_v24 = vlaneseq }
   0xc   :  { %v47_v1 = vld [vmem:[%s910_s1] sm:$0xff]  ;;  %520 = vset.pattern.permute.xlu1 %v561_v2  ;;  %64 = vrot.lane.b32.xlu0 %v617_v0, %s562_s4  ;;  %v565_v5 = vmov 4   ;;  %v566_v6 = vmov 5   ;;  %s567_s1 = smov 15   ;;  %v568_v7 = vmov 2   ;;  %s569_s0 = smov 1  }
   0xd   :  { %81 = vperm.xlu1 %520, %v47_v1   ;;  %90 = vrot.lane.b32.xlu2 %v626_v3, %s563_s6  ;;  %v570_v8 = vmov 3   ;;  %s571_s7 = smov 127   ;;  %s572_s8 = smov 113   ;;  %v574_v9 = vmov 6   ;;  %v576_v10 = vmov 7   ;;  %v48_v11 = vld [vmem:[%s911_s2] sm:$0xff] }
   0xe   :  { %521 = vset.pattern.permute.xlu2 %v564_v4  ;;  %524 = vset.pattern.permute.xlu0 %v565_v5  ;;  %s573_s9 = smov 112   ;;  %s575_s10 = smov 111   ;;  %v577_v12 = vmov 8   ;;  %v646_v26 = vand.u32 127, %v49_v24 }
   0xf   :  { %s721_s2 = sld [smem:[#allocation2]] }
  0x10   :  { %v51_v28 = vadd.s32 128, %v646_v26  ;;  %v52_v31 = vshra.s32 %v646_v26, 4  ;;  %v54_v32 = vand.u32 15, %v646_v26  ;;  %vm68_vm4 = vcmp.lt.s32.totalorder %v646_v26, 17  ;;  %s724_s13 = sld [smem:[#allocation2 + $0x1]] }
  0x11   :  { %vm92_vm5 = vcmp.lt.s32.totalorder %v646_v26, 16  ;;  %vm113_vm9 = vcmp.lt.s32.totalorder %v646_v26, 15  ;;  %vm136_vm12 = vcmp.lt.s32.totalorder %v646_v26, 1  ;;  %vm165_vm14 = vcmp.lt.s32.totalorder %v646_v26, 127  ;;  %s734_s14 = sld [smem:[#allocation2 + $0x2]] }
  0x12   :  { %v53_v33 = vshra.s32 %v51_v28, 4  ;;  %v55_v34 = vand.u32 15, %v51_v28  ;;  %vm657_vm0 = vcmp.ge.s32.totalorder %v52_v31, 1  ;;  %vm661_vm1 = vcmp.ge.s32.totalorder %v54_v32, 1  ;;  %s744_s15 = sld [smem:[#allocation2 + $0x3]] }
  0x13   :  { %vm677_vm6 = vcmp.le.s32.totalorder %v54_v32, 14  ;;  %vm71_vm7 = vmand %vm657_vm0, %vm661_vm1  ;;  %vm186_vm15 = vcmp.lt.s32.totalorder %v646_v26, 113  ;;  %s750_s16 = sld [smem:[#allocation2 + $0x80]] }
  0x14   :  { %66 = vrot.lane.b32.xlu0 %v626_v3, %s562_s4  ;;  %vm665_vm2 = vcmp.ge.s32.totalorder %v53_v33, 1  ;;  %vm669_vm3 = vcmp.ge.s32.totalorder %v55_v34, 1  ;;  %vm685_vm8 = vcmp.le.s32.totalorder %v55_v34, 14  ;;  %vm116_vm11 = vmand %vm657_vm0, %vm677_vm6  ;;  %s760_s17 = sld [smem:[#allocation2 + $0x81]] }
  0x15   :  { %88 = vrot.lane.b32.xlu1 %v617_v0, %s563_s6  ;;  %102 = vperm.xlu2 %521, %v47_v1   ;;  %vm72_vm10 = vmand %vm665_vm2, %vm669_vm3  ;;  %s774_s18 = sld [smem:[#allocation2 + $0x82]] }
  0x16   :  { %525 = vset.pattern.permute.xlu1 %v566_v6  ;;  %vm117_vm13 = vmand %vm665_vm2, %vm685_vm8  ;;  %s777_s19 = sld [smem:[#allocation2 + $0x83]] }
  0x17   :  { %s783_s20 = sld [smem:[#allocation2 + $0x100]] }
  0x18   :  { %s785_s21 = sld [smem:[#allocation2 + $0x101]] }
  0x19   :  { %s791_s22 = sld [smem:[#allocation2 + $0x102]] }
  0x1a   :  { %s801_s23 = sld [smem:[#allocation2 + $0x103]] }
  0x1b   :  { %s803_s24 = sld [smem:[#allocation2 + $0x180]] }
  0x1c   :  { %109 = vrot.lane.b32.xlu0 %v617_v0, %s567_s1  ;;  %s805_s25 = sld [smem:[#allocation4]] }
  0x1d   :  { %111 = vrot.lane.b32.xlu1 %v626_v3, %s567_s1  ;;  %522 = vset.pattern.permute.xlu2 %v568_v7  ;;  %s807_s26 = sld [smem:[#allocation2 + $0x181]] }
  0x1e   :  { %125 = vperm.xlu2 %522, %v47_v1   ;;  %s809_s27 = sld [smem:[#allocation4 + $0x1]] }
  0x1f   :  { %s811_s3 = sld [smem:[#allocation4 + $0x2]] }
  0x20   :  { %s813_s28 = sld [smem:[#allocation2 + $0x182]] }
  0x21   :  { %s815_s4 = sld [smem:[#allocation2 + $0x183]] }
  0x22   :  { %s868_s29 = sld [smem:[#allocation4 + $0x3]] }
  0x24   :  { %132 = vrot.lane.b32.xlu0 %v617_v0, %s569_s0  ;;  %v355_v7 = vstv %s809_s27 }
  0x25   :  { %134 = vrot.lane.b32.xlu1 %v626_v3, %s569_s0 }
  0x26   :  { %523 = vset.pattern.permute.xlu2 %v570_v8  ;;  %v358_v8 = vstv %s783_s20 }
  0x27   :  { %146 = vperm.xlu2 %523, %v47_v1  }
  0x2c   :  { %154 = vperm.xlu0 %524, %v47_v1  }
  0x2d   :  { %161 = vrot.lane.b32.xlu1 %v617_v0, %s571_s7 }
  0x2f   :  { %163 = vrot.lane.b32.xlu2 %v626_v3, %s571_s7 }
  0x30   :  { %529 = vset.pattern.permute.xlu2 %v561_v2 }
  0x34   :  { %184 = vrot.lane.b32.xlu0 %v626_v3, %s572_s8 }
  0x35   :  { %175 = vperm.xlu1 %525, %v47_v1   ;;  %530 = vset.pattern.permute.xlu0 %v561_v2 }
  0x37   :  { %182 = vrot.lane.b32.xlu2 %v617_v0, %s572_s8 }
  0x3c   :  { %207 = vrot.lane.b32.xlu0 %v626_v3, %s573_s9 }
  0x3d   :  { %526 = vset.pattern.permute.xlu1 %v574_v9 }
  0x3e   :  { %198 = vperm.xlu1 %526, %v47_v1  }
  0x3f   :  { %205 = vrot.lane.b32.xlu2 %v617_v0, %s573_s9 }
  0x44   :  { %228 = vrot.lane.b32.xlu0 %v626_v3, %s575_s10 }
  0x46   :  { %527 = vset.pattern.permute.xlu1 %v576_v10 }
  0x47   :  { %219 = vperm.xlu1 %527, %v47_v1   ;;  %226 = vrot.lane.b32.xlu2 %v617_v0, %s575_s10 }
  0x4f   :  { %528 = vset.pattern.permute.xlu1 %v577_v12  ;;  %251 = vperm.xlu2 %529, %v48_v11  }
  0x50   :  { %242 = vperm.xlu1 %528, %v47_v1  }
  0x67   :  { %v91_v13 = vpop.permute.xlu2 %90 }
  0x6f   :  { %v103_v16 = vpop.permute.xlu2 %102 }
  0x78   :  { %v126_v19 = vpop.permute.xlu2 %125 }
  0x7e   :  { %v65_v14 = vpop.permute.xlu0 %64 }
  0x7f   :  { %v82_v15 = vpop.permute.xlu1 %81 }
  0x81   :  { %v147_v22 = vpop.permute.xlu2 %146 }
  0x86   :  { %v67_v17 = vpop.permute.xlu0 %66 }
  0x87   :  { %v89_v18 = vpop.permute.xlu1 %88  ;;  %v69_v44 = vsel %vm68_vm4, %v65_v14, %v67_v17  ;;  %v70_v45 = vsel %vm68_vm4, %v67_v17, %v65_v14  ;;  %vm209_vm4 = vcmp.lt.s32.totalorder %v646_v26, 112 }
  0x88   :  { %v93_v46 = vsel %vm92_vm5, %v89_v18, %v91_v13  ;;  %v94_v47 = vsel %vm92_vm5, %v91_v13, %v89_v18  ;;  %v77_v50 = vsel %vm71_vm7, %v70_v45, 0.0  ;;  %v78_v51 = vsel %vm72_vm10, %v69_v44, 0.0 }
  0x89   :  { %v648_v27 = vpop.permute.xlu2 %163  ;;  %v99_v52 = vsel %vm657_vm0, %v94_v47, 0.0  ;;  %v100_v53 = vsel %vm665_vm2, %v93_v46, 0.0  ;;  %v84_v58 = vmul.f32 %v82_v15, %v77_v50  ;;  %v85_v59 = vmul.f32 %v82_v15, %v78_v51 }
  0x8a   :  { %v105_v60 = vmul.f32 %v103_v16, %v99_v52  ;;  %v106_v61 = vmul.f32 %v103_v16, %v100_v53  ;;  %vm713_vm0 = vcmp.le.s32.totalorder %v52_v31, 14  ;;  %vm717_vm2 = vcmp.le.s32.totalorder %v53_v33, 14 }
  0x8b   :  { %vm189_vm5 = vmand %vm713_vm0, %vm661_vm1  ;;  %vm460_vm10 = vcmask 1042432  }
  0x8c   :  { %v107_v9 = vadd.f32 %v105_v60, %v84_v58  ;;  %v108_v10 = vadd.f32 %v106_v61, %v85_v59  ;;  %vm190_vm7 = vmand %vm717_vm2, %vm669_vm3  ;;  %v280_v58 = vstv %s721_s2  ;;  %v283_v59 = vstv %s724_s13 }
  0x8d   :  { %v294_v60 = vstv %s734_s14  ;;  %v305_v61 = vstv %s744_s15 }
  0x8e   :  { %v110_v20 = vpop.permute.xlu0 %109 }
  0x8f   :  { %v112_v21 = vpop.permute.xlu1 %111 }
  0x90   :  { %v114_v48 = vsel %vm113_vm9, %v110_v20, %v112_v21  ;;  %v115_v49 = vsel %vm113_vm9, %v112_v21, %v110_v20  ;;  %vm230_vm9 = vcmp.lt.s32.totalorder %v646_v26, 111 }
  0x91   :  { %v183_v37 = vpop.permute.xlu2 %182  ;;  %v122_v56 = vsel %vm116_vm11, %v115_v49, 0.0  ;;  %v123_v57 = vsel %vm117_vm13, %v114_v48, 0.0  ;;  %vm463_vm11 = vcmask 1043456   ;;  %vm469_vm13 = vcmask 1045504  }
  0x92   :  { %v128_v4 = vmul.f32 %v126_v19, %v122_v56  ;;  %v129_v5 = vmul.f32 %v126_v19, %v123_v57 }
  0x94   :  { %v130_v13 = vadd.f32 %v128_v4, %v107_v9  ;;  %v131_v14 = vadd.f32 %v129_v5, %v108_v10  ;;  %v322_v4 = vstv %s760_s17  ;;  %v333_v5 = vstv %s774_s18 }
  0x96   :  { %v133_v23 = vpop.permute.xlu0 %132 }
  0x97   :  { %v135_v25 = vpop.permute.xlu1 %134 }
  0x98   :  { %v137_v54 = vsel %vm136_vm12, %v133_v23, %v135_v25  ;;  %v138_v55 = vsel %vm136_vm12, %v135_v25, %v133_v23  ;;  %vm466_vm12 = vcmask 1044480  }
  0x99   :  { %v206_v63 = vpop.permute.xlu2 %205  ;;  %v143_v1 = vsel %vm661_vm1, %v138_v55, 0.0  ;;  %v144_v2 = vsel %vm669_vm3, %v137_v54, 0.0  ;;  %vm233_vm1 = vmand %vm713_vm0, %vm677_vm6 }
  0x9a   :  { %v149_v11 = vmul.f32 %v147_v22, %v143_v1  ;;  %v150_v12 = vmul.f32 %v147_v22, %v144_v2  ;;  %vm234_vm3 = vmand %vm717_vm2, %vm685_vm8  ;;  %v319_v2 = vstv %s750_s16 }
  0x9c   :  { %v151_v19 = vadd.f32 %v149_v11, %v130_v13  ;;  %v152_v20 = vadd.f32 %v150_v12, %v131_v14  ;;  %v361_v11 = vstv %s785_s21  ;;  %v372_v12 = vstv %s791_s22 }
  0x9d   :  { %v383_v13 = vstv %s801_s23  ;;  %v394_v14 = vstv %s811_s3 }
  0x9e   :  { %v653_v30 = vpop.permute.xlu0 %154 }
  0x9f   :  { %v651_v29 = vpop.permute.xlu1 %161  ;;  %v157_v21 = vmul.f32 %v653_v30, %v617_v0  ;;  %v158_v22 = vmul.f32 %v653_v30, %v626_v3 }
  0xa0   :  { %v166_v15 = vsel %vm165_vm14, %v651_v29, %v648_v27  ;;  %v167_v16 = vsel %vm165_vm14, %v648_v27, %v651_v29  ;;  %vm472_vm14 = vcmask 1046528  }
  0xa1   :  { %v172_v23 = vsel %vm677_vm6, %v166_v15, 0.0  ;;  %v173_v24 = vsel %vm685_vm8, %v167_v16, 0.0  ;;  %v227_v31 = vpop.permute.xlu2 %226  ;;  %v159_v32 = vadd.f32 %v157_v21, %v151_v19  ;;  %v160_v33 = vadd.f32 %v158_v22, %v152_v20 }
  0xa2   :  { %v397_v15 = vstv %s803_s24  ;;  %v400_v16 = vstv %s807_s26  ;;  %v411_v19 = vstv %s813_s28  ;;  %v422_v20 = vstv %s815_s4 }
  0xa3   :  { %vm454_vm6 = vcmask 1040384   ;;  %vm457_vm8 = vcmask 1041408  }
  0xa6   :  { %v185_v42 = vpop.permute.xlu0 %184 }
  0xa7   :  { %v675_v40 = vpop.permute.xlu1 %175  ;;  %v187_v17 = vsel %vm186_vm15, %v183_v37, %v185_v42  ;;  %v188_v18 = vsel %vm186_vm15, %v185_v42, %v183_v37 }
  0xa8   :  { %v178_v0 = vmul.f32 %v675_v40, %v172_v23  ;;  %v179_v3 = vmul.f32 %v675_v40, %v173_v24  ;;  %v195_v29 = vsel %vm189_vm5, %v187_v17, 0.0  ;;  %v196_v30 = vsel %vm190_vm7, %v188_v18, 0.0 }
  0xa9   :  { %v252_v53 = vpop.permute.xlu2 %251 }
  0xaa   :  { %v180_v39 = vadd.f32 %v178_v0, %v159_v32  ;;  %v181_v40 = vadd.f32 %v179_v3, %v160_v33 }
  0xae   :  { %v208_v6 = vpop.permute.xlu0 %207 }
  0xaf   :  { %v210_v25 = vsel %vm209_vm4, %v206_v63, %v208_v6  ;;  %v211_v27 = vsel %vm209_vm4, %v208_v6, %v206_v63  ;;  %v344_v6 = vstv %s777_s19 }
  0xb0   :  { %v199_v62 = vpop.permute.xlu1 %198  ;;  %v216_v34 = vsel %vm713_vm0, %v210_v25, 0.0  ;;  %v217_v35 = vsel %vm717_vm2, %v211_v27, 0.0 }
  0xb1   :  { %v201_v37 = vmul.f32 %v199_v62, %v195_v29  ;;  %v202_v38 = vmul.f32 %v199_v62, %v196_v30  ;;  %v316_v62 = vstv %s805_s25 }
  0xb3   :  { %v203_v41 = vadd.f32 %v201_v37, %v180_v39  ;;  %v204_v47 = vadd.f32 %v202_v38, %v181_v40 }
  0xb6   :  { %v229_v36 = vpop.permute.xlu0 %228 }
  0xb7   :  { %v231_v45 = vsel %vm230_vm9, %v227_v31, %v229_v36  ;;  %v232_v46 = vsel %vm230_vm9, %v229_v36, %v227_v31 }
  0xb8   :  { %v239_v49 = vsel %vm233_vm1, %v231_v45, 0.0  ;;  %v240_v50 = vsel %vm234_vm3, %v232_v46, 0.0 }
  0xb9   :  { %v220_v28 = vpop.permute.xlu1 %219 }
  0xba   :  { %v222_v42 = vmul.f32 %v220_v28, %v216_v34  ;;  %v223_v44 = vmul.f32 %v220_v28, %v217_v35 }
  0xbc   :  { %v224_v26 = vadd.f32 %v222_v42, %v203_v41  ;;  %v225_v43 = vadd.f32 %v223_v44, %v204_v47 }
  0xc2   :  { %v243_v48 = vpop.permute.xlu1 %242 }
  0xc3   :  { %v245_v51 = vmul.f32 %v243_v48, %v239_v49  ;;  %v246_v52 = vmul.f32 %v243_v48, %v240_v50 }
  0xc5   :  { %v247_v54 = vadd.f32 %v245_v51, %v224_v26  ;;  %v248_v55 = vadd.f32 %v246_v52, %v225_v43 }
  0xc7   :  { %v254_v56 = vadd.f32 %v252_v53, %v247_v54  ;;  %v255_v57 = vadd.f32 %v252_v53, %v248_v55 }
  0xc9   :  { %v256_v63 = vmax.f32 %v254_v56, 0.0  ;;  %v257_v1 = vmax.f32 %v255_v57, 0.0 }
  0xcb   :  { %v828_v9 = vmin.f32 %v256_v63, 6.0  ;;  %v830_v10 = vmin.f32 %v257_v1, 6.0 }
  0xcd   :  { %v284_v17 = vmul.f32 %v283_v59, %v828_v9  ;;  %v285_v18 = vmul.f32 %v283_v59, %v830_v10  ;;  %v295_v21 = vmul.f32 %v294_v60, %v828_v9  ;;  %v296_v22 = vmul.f32 %v294_v60, %v830_v10 }
  0xce   :  { %v281_v23 = vmul.f32 %v280_v58, %v828_v9  ;;  %v282_v24 = vmul.f32 %v280_v58, %v830_v10  ;;  %v306_v3 = vmul.f32 %v305_v61, %v828_v9  ;;  %v307_v29 = vmul.f32 %v305_v61, %v830_v10 }
  0xcf   :  { %v288_v25 = vrot.slane %v284_v17, 1  ;;  %v289_v27 = vrot.slane %v285_v18, 1  ;;  %v299_v28 = vrot.slane %v295_v21, 2  ;;  %v300_v0 = vrot.slane %v296_v22, 2 }
  0xd0   :  { %v323_v32 = vmul.f32 %v322_v4, %v828_v9  ;;  %v324_v33 = vmul.f32 %v322_v4, %v830_v10  ;;  %v334_v34 = vmul.f32 %v333_v5, %v828_v9  ;;  %v335_v35 = vmul.f32 %v333_v5, %v830_v10 }
  0xd1   :  { %v292_v30 = vadd.f32 %v288_v25, %v281_v23  ;;  %v293_v31 = vadd.f32 %v289_v27, %v282_v24  ;;  %v345_v36 = vmul.f32 %v344_v6, %v828_v9  ;;  %v346_v37 = vmul.f32 %v344_v6, %v830_v10 }
  0xd2   :  { %v320_v38 = vmul.f32 %v319_v2, %v828_v9  ;;  %v321_v39 = vmul.f32 %v319_v2, %v830_v10  ;;  %v327_v40 = vrot.slane %v323_v32, 1  ;;  %v328_v42 = vrot.slane %v324_v33, 1 }
  0xd3   :  { %v303_v44 = vadd.f32 %v299_v28, %v292_v30  ;;  %v304_v45 = vadd.f32 %v300_v0, %v293_v31  ;;  %v310_v46 = vrot.slane %v306_v3, 3  ;;  %v311_v41 = vrot.slane %v307_v29, 3 }
  0xd4   :  { %v331_v47 = vadd.f32 %v327_v40, %v320_v38  ;;  %v332_v48 = vadd.f32 %v328_v42, %v321_v39  ;;  %v338_v49 = vrot.slane %v334_v34, 2  ;;  %v339_v50 = vrot.slane %v335_v35, 2 }
  0xd5   :  { %v349_v26 = vrot.slane %v345_v36, 3  ;;  %v350_v43 = vrot.slane %v346_v37, 3  ;;  %v362_v51 = vmul.f32 %v361_v11, %v828_v9  ;;  %v363_v52 = vmul.f32 %v361_v11, %v830_v10 }
  0xd6   :  { %v342_v53 = vadd.f32 %v338_v49, %v331_v47  ;;  %v343_v54 = vadd.f32 %v339_v50, %v332_v48  ;;  %v359_v55 = vmul.f32 %v358_v8, %v828_v9  ;;  %v360_v56 = vmul.f32 %v358_v8, %v830_v10 }
  0xd7   :  { %v366_v57 = vrot.slane %v362_v51, 1  ;;  %v367_v58 = vrot.slane %v363_v52, 1  ;;  %v373_v59 = vmul.f32 %v372_v12, %v828_v9  ;;  %v374_v60 = vmul.f32 %v372_v12, %v830_v10 }
  0xd8   :  { %v353_v61 = vadd.f32 %v349_v26, %v342_v53  ;;  %v354_v63 = vadd.f32 %v350_v43, %v343_v54  ;;  %v384_v1 = vmul.f32 %v383_v13, %v828_v9  ;;  %v385_v2 = vmul.f32 %v383_v13, %v830_v10 }
  0xd9   :  { %v370_v4 = vadd.f32 %v366_v57, %v359_v55  ;;  %v371_v5 = vadd.f32 %v367_v58, %v360_v56  ;;  %v377_v6 = vrot.slane %v373_v59, 2  ;;  %v378_v8 = vrot.slane %v374_v60, 2 }
  0xda   :  { %v314_v11 = vadd.f32 %v310_v46, %v303_v44  ;;  %v315_v17 = vadd.f32 %v311_v41, %v304_v45  ;;  %v356_v12 = vadd.f32 %v355_v7, %v353_v61  ;;  %v357_v18 = vadd.f32 %v355_v7, %v354_v63 }
  0xdb   :  { %v381_v21 = vadd.f32 %v377_v6, %v370_v4  ;;  %v382_v13 = vadd.f32 %v378_v8, %v371_v5  ;;  %v388_v22 = vrot.slane %v384_v1, 3  ;;  %v389_v23 = vrot.slane %v385_v2, 3 }
  0xdc   :  { %v401_v24 = vmul.f32 %v400_v16, %v828_v9  ;;  %v402_v25 = vmul.f32 %v400_v16, %v830_v10  ;;  %v412_v27 = vmul.f32 %v411_v19, %v828_v9  ;;  %v413_v7 = vmul.f32 %v411_v19, %v830_v10 }
  0xdd   :  { %v392_v28 = vadd.f32 %v388_v22, %v381_v21  ;;  %v393_v0 = vadd.f32 %v389_v23, %v382_v13  ;;  %v398_v3 = vmul.f32 %v397_v15, %v828_v9  ;;  %v399_v29 = vmul.f32 %v397_v15, %v830_v10 }
  0xde   :  { %v405_v30 = vrot.slane %v401_v24, 1  ;;  %v406_v31 = vrot.slane %v402_v25, 1  ;;  %v423_v16 = vmul.f32 %v422_v20, %v828_v9  ;;  %v424_v32 = vmul.f32 %v422_v20, %v830_v10 }
  0xdf   :  { %v395_v19 = vadd.f32 %v394_v14, %v392_v28  ;;  %v396_v33 = vadd.f32 %v394_v14, %v393_v0  ;;  %v416_v34 = vrot.slane %v412_v27, 2  ;;  %v417_v35 = vrot.slane %v413_v7, 2 }
  0xe0   :  { %v409_v36 = vadd.f32 %v405_v30, %v398_v3  ;;  %v410_v37 = vadd.f32 %v406_v31, %v399_v29  ;;  %v438_v38 = vrot.slane %v356_v12, 7  ;;  %v439_v39 = vrot.slane %v357_v18, 7 }
  0xe1   :  { %v317_v15 = vadd.f32 %v316_v62, %v314_v11  ;;  %v318_v40 = vadd.f32 %v316_v62, %v315_v17  ;;  %v427_v44 = vrot.slane %v423_v16, 3  ;;  %v428_v10 = vrot.slane %v424_v32, 3 }
  0xe2   :  { %v420_v9 = vadd.f32 %v416_v34, %v409_v36  ;;  %v421_v42 = vadd.f32 %v417_v35, %v410_v37  ;;  %v433_v20 = vstv %s868_s29  ;;  %v444_v45 = vrot.slane %v395_v19, 6 }
  0xe3   :  { %v445_v46 = vrot.slane %v396_v33, 6  ;;  %v455_v47 = vsel %vm454_vm6, %v317_v15, %v438_v38  ;;  %v456_v48 = vsel %vm454_vm6, %v318_v40, %v439_v39 }
  0xe4   :  { %v431_v14 = vadd.f32 %v427_v44, %v420_v9  ;;  %v432_v41 = vadd.f32 %v428_v10, %v421_v42  ;;  %v458_v26 = vsel %vm457_vm8, %v455_v47, %v444_v45 }
  0xe5   :  { %v459_v43 = vsel %vm457_vm8, %v456_v48, %v445_v46 }
  0xe6   :  { %v434_v49 = vadd.f32 %v433_v20, %v431_v14  ;;  %v435_v50 = vadd.f32 %v433_v20, %v432_v41 }
  0xe8   :  { %v450_v51 = vrot.slane %v434_v49, 5  ;;  %v451_v62 = vrot.slane %v435_v50, 5 }
  0xea   :  { %v461_v52 = vsel %vm460_vm10, %v458_v26, %v450_v51  ;;  %v462_v53 = vsel %vm460_vm10, %v459_v43, %v451_v62 }
  0xeb   :  { %v464_v54 = vsel %vm463_vm11, %v461_v52, %v317_v15  ;;  %v465_v55 = vsel %vm463_vm11, %v462_v53, %v318_v40 }
  0xec   :  { %v467_v56 = vsel %vm466_vm12, %v464_v54, %v438_v38  ;;  %v468_v57 = vsel %vm466_vm12, %v465_v55, %v439_v39 }
  0xed   :  { %v470_v58 = vsel %vm469_vm13, %v467_v56, %v444_v45  ;;  %v471_v59 = vsel %vm469_vm13, %v468_v57, %v445_v46 }
  0xee   :  { %v473_v60 = vsel %vm472_vm14, %v470_v58, %v450_v51  ;;  %v474_v61 = vsel %vm472_vm14, %v471_v59, %v451_v62 }
  0xef   :  { %475 = vst [vmem:[%s914_s5] sm:$0xff] %v473_v60 }
  0xf0   :  { %476 = vst [vmem:[%s914_s5 + $0x8] sm:$0xff] %v474_v61 }
  0xf1   :  { %481 = vsyncpa [#allocation3], 1 }
  0xf2   :  { %482 = vsyncpa [#allocation5], 1 }

</bundles_post_ra>
